<compile_context>
chip_gen: v7x
topology: tpu7x:2x2x1
jax: 0.10.0
libtpu: 0.0.40
codegen_flags: <defaults>
</compile_context>

<pallas_src>
import jax
import jax.numpy as jnp
from jax.experimental import pallas as pl
from jax.experimental.pallas import tpu as pltpu


# ----------------------------- kernel ----------------------------------------

def fused_head_kernel(cls_ref, w1_ref, b1_ref, gamma_ref, beta_ref, w2_ref,
                      choice_sel_ref, example_gather_ref, b2_ref,
                      logits_ref, probs_ref, preds_ref):
    """Pooler(dense+tanh) -> LayerNorm -> VPU projection -> softmax -> argmax."""
    num_choices = logits_ref.shape[-1]

    # Pooler dense. Casting x to the weight dtype lets callers opt into a bf16
    # MXU path (f32 accumulation) by passing bf16 pool_w; the default stays f32
    # for exact parity with the PyTorch reference.
    w1 = w1_ref[...]
    x = cls_ref[...].astype(w1.dtype)                              # (rows, H)
    h = jnp.dot(x, w1, preferred_element_type=jnp.float32) + b1_ref[...]
    h = jnp.tanh(h)

    # LayerNorm (eps=1e-5). Single-pass moments: tanh output is bounded in
    # [-1, 1], so E[h^2] - E[h]^2 is numerically safe and saves one XLU pass.
    mu = jnp.mean(h, axis=-1, keepdims=True)
    var = jnp.mean(h * h, axis=-1, keepdims=True) - mu * mu
    hn = (h - mu) * jax.lax.rsqrt(var + 1e-5)
    hn = hn * gamma_ref[...] + beta_ref[...]
    # Dropout layers are identity in eval mode.

    # Final Linear(H, 1) on the VPU: per-row score = sum_h hn * w2 + b2.
    scores = jnp.sum(hn * w2_ref[...], axis=-1, keepdims=True) + b2_ref[0]

    # Regroup per-row scores (rows, 1) into lane-dense (examples, choices) via a
    # tiny constant permutation matmul (a Mosaic-safe "reshape"):
    #   logits[b, c] = scores[b * num_choices + c]
    logits = jnp.dot(example_gather_ref[...], scores * choice_sel_ref[...],
                     preferred_element_type=jnp.float32)
    logits_ref[...] = logits

    # Softmax over the choices dim.
    m = jnp.max(logits, axis=-1, keepdims=True)
    p = jnp.exp(logits - m)
    probs_ref[...] = p / jnp.sum(p, axis=-1, keepdims=True)

    # Argmax (first max index), reusing the row max; clamp keeps NaN rows in range.
    idx = jax.lax.broadcasted_iota(jnp.int32, logits.shape, 1)
    masked = jnp.where(logits == m, idx, num_choices)
    preds_ref[...] = jnp.minimum(
        jnp.min(masked, axis=-1, keepdims=True), num_choices - 1
    ).astype(jnp.int32)


# ----------------------------- wrapper ----------------------------------------

def _pick_block_b(batch, num_choices, max_rows=1024):
    """Examples per grid tile: divides batch; row count multiple of 8 if tiling."""
    if batch * num_choices <= max_rows:
        return batch
    for bb in range(min(batch, max_rows // max(num_choices, 1)), 0, -1):
        if batch % bb == 0 and bb % 8 == 0:
            return bb
    return batch


def basic_model_head(hidden_states, params):
    """hidden_states: (B, num_choices, S, H) float32 encoder output.

    Returns (logits (B, C), probabilities (B, C), preds (B,) int32), matching
    BasicModel.forward outputs in eval mode with cfg.norm=True.
    """
    B, C, S, H = hidden_states.shape
    N = B * C

    # CLS-token gather fused into the BlockSpec: view as (N, S*H) (free,
    # row-major), so lane-block 0 of width H is exactly token 0 of every row.
    # Valid whenever H is a multiple of 128 (true for real BERT/RoBERTa sizes).
    if H % 128 == 0 or S == 1:
        cls_src = hidden_states.reshape(N, S * H)
    else:
        # TODO(synk): fallback slices CLS in XLA (extra HBM round trip).
        cls_src = hidden_states.reshape(N, S, H)[:, 0, :]

    block_b = _pick_block_b(B, C)          # examples per tile
    rows = block_b * C                     # activation rows per tile
    grid = (B // block_b,)

    # Constant regroup matrices (identical for every tile), built in XLA:
    #   choice_sel[n, c]     = 1  iff n % C == c
    #   example_gather[b, n] = 1  iff n // C == b
    n_ids = jnp.arange(rows, dtype=jnp.int32)
    choice_sel = (n_ids[:, None] % C ==
                  jnp.arange(C, dtype=jnp.int32)[None, :]).astype(jnp.float32)
    example_gather = (n_ids[None, :] // C ==
                      jnp.arange(block_b, dtype=jnp.int32)[:, None]
                      ).astype(jnp.float32)

    w1 = params["pool_w"]        # (H, H), laid out for x @ w1
    b1 = params["pool_b"]        # (1, H)
    gamma = params["ln_g"]       # (1, H)
    beta = params["ln_b"]        # (1, H)
    w2 = params["lin_w"]         # (1, H) scoring weight as a lane-dense row
    b2 = params["lin_b"]         # (1,)   scoring bias -> SMEM scalar

    const = lambda shape: pl.BlockSpec(shape, lambda i: (0,) * len(shape))

    logits, probs, preds = pl.pallas_call(
        fused_head_kernel,
        grid=grid,
        in_specs=[
            pl.BlockSpec((rows, H), lambda i: (i, 0)),          # CLS activations
            const((H, H)),                                      # pooler weight (VMEM-resident)
            const((1, H)),                                      # pooler bias
            const((1, H)),                                      # LN gamma
            const((1, H)),                                      # LN beta
            const((1, H)),                                      # scoring weight row
            const((rows, C)),                                   # choice_sel
            const((block_b, rows)),                             # example_gather
            pl.BlockSpec(memory_space=pltpu.MemorySpace.SMEM),  # scoring bias
        ],
        out_specs=[
            pl.BlockSpec((block_b, C), lambda i: (i, 0)),
            pl.BlockSpec((block_b, C), lambda i: (i, 0)),
            pl.BlockSpec((block_b, 1), lambda i: (i, 0)),
        ],
        out_shape=(
            jax.ShapeDtypeStruct((B, C), jnp.float32),
            jax.ShapeDtypeStruct((B, C), jnp.float32),
            jax.ShapeDtypeStruct((B, 1), jnp.int32),
        ),
        compiler_params=pltpu.CompilerParams(
            dimension_semantics=("parallel",)),
    )(cls_src, w1, b1, gamma, beta, w2, choice_sel, example_gather, b2)

    return logits, probs, preds.reshape(B)


# ----------------------------- params / reference ----------------------------

def init_params(key, hidden):
    """Matches BasicModel._init_weights: Linear weights ~ N(0, 0.02), biases 0,
    LayerNorm weight = 1, bias = 0. pool_w / lin_w stored pre-transposed for x@W."""
    k1, k2 = jax.random.split(key)
    return {
        "pool_w": 0.02 * jax.random.normal(k1, (hidden, hidden), jnp.float32),
        "pool_b": jnp.zeros((1, hidden), jnp.float32),
        "ln_g": jnp.ones((1, hidden), jnp.float32),
        "ln_b": jnp.zeros((1, hidden), jnp.float32),
        "lin_w": 0.02 * jax.random.normal(k2, (1, hidden), jnp.float32),
        "lin_b": jnp.zeros((1,), jnp.float32),
    }


def reference_head(hidden_states, params):
    """Pure-JAX reference of the same eval-mode forward path."""
    B, C, S, H = hidden_states.shape
    x = hidden_states[:, :, 0, :].reshape(B * C, H)
    h = jnp.tanh(x @ params["pool_w"] + params["pool_b"])
    mu = jnp.mean(h, axis=-1, keepdims=True)
    var = jnp.mean((h - mu) ** 2, axis=-1, keepdims=True)
    hn = (h - mu) / jnp.sqrt(var + 1e-5) * params["ln_g"] + params["ln_b"]
    logits = (jnp.sum(hn * params["lin_w"], axis=-1)
              + params["lin_b"][0]).reshape(B, C)
    probs = jax.nn.softmax(logits, axis=-1)
    preds = jnp.argmax(probs, axis=-1).astype(jnp.int32)
    return logits, probs, preds


# ----------------------------- main -------------------------------------------

if __name__ == "__main__":
    # batch, num_choices, seq_len, hidden (hidden kept a multiple of 128, as in
    # real BERT/RoBERTa, so the fused CLS-gather BlockSpec path is exercised).
    B, C, S, H = 2, 4, 8, 128

    key = jax.random.PRNGKey(0)
    k_hidden, k_params = jax.random.split(key)

    # Synthetic encoder output standing in for BERT/RoBERTa hidden states.
    hidden_states = jax.random.normal(k_hidden, (B, C, S, H), jnp.float32)
    params = init_params(k_params, H)

    logits, probs, preds = basic_model_head(hidden_states, params)
    jax.block_until_ready((logits, probs, preds))

    assert logits.shape == (B, C)
    assert probs.shape == (B, C)
    assert preds.shape == (B,)

    # Sanity check against the pure-JAX reference.
    ref_logits, ref_probs, ref_preds = reference_head(hidden_states, params)
    assert jnp.allclose(logits, ref_logits, atol=1e-2, rtol=1e-2)
    assert jnp.allclose(probs, ref_probs, atol=1e-2, rtol=1e-2)
    sorted_ref = jnp.sort(ref_logits, axis=-1)
    near_tie = (sorted_ref[:, -1] - sorted_ref[:, -2]) < 1e-2
    assert bool(jnp.all((preds == ref_preds) | near_tie))

    print("KERNEL_OK")
</pallas_src>

<mosaic_0001>
module attributes {stable_mosaic.version = 11 : i64} {
  func.func @fused_head_kernel(%arg0: i32, %arg1: memref<8x128xf32, #tpu.memory_space<vmem>>, %arg2: memref<128x128xf32, #tpu.memory_space<vmem>>, %arg3: memref<1x128xf32, #tpu.memory_space<vmem>>, %arg4: memref<1x128xf32, #tpu.memory_space<vmem>>, %arg5: memref<1x128xf32, #tpu.memory_space<vmem>>, %arg6: memref<1x128xf32, #tpu.memory_space<vmem>>, %arg7: memref<8x4xf32, #tpu.memory_space<vmem>>, %arg8: memref<2x8xf32, #tpu.memory_space<vmem>>, %arg9: memref<1xf32, #tpu.memory_space<smem>>, %arg10: memref<2x4xf32, #tpu.memory_space<vmem>>, %arg11: memref<2x4xf32, #tpu.memory_space<vmem>>, %arg12: memref<2x1xi32, #tpu.memory_space<vmem>>) attributes {dimension_semantics = [#tpu.dimension_semantics<parallel>], iteration_bounds = array<i64: 1>, scalar_prefetch = 0 : i64, scratch_operands = 0 : i64, tpu.core_type = #tpu.core_type<tc>, window_params = [{transform_indices = @transform_0, window_bounds = array<i64: 8, 128>}, {pipeline_mode = #tpu.pipeline_mode<synchronous>, transform_indices = @transform_1, window_bounds = array<i64: 128, 128>}, {pipeline_mode = #tpu.pipeline_mode<synchronous>, transform_indices = @transform_2, window_bounds = array<i64: 1, 128>}, {pipeline_mode = #tpu.pipeline_mode<synchronous>, transform_indices = @transform_3, window_bounds = array<i64: 1, 128>}, {pipeline_mode = #tpu.pipeline_mode<synchronous>, transform_indices = @transform_4, window_bounds = array<i64: 1, 128>}, {pipeline_mode = #tpu.pipeline_mode<synchronous>, transform_indices = @transform_5, window_bounds = array<i64: 1, 128>}, {pipeline_mode = #tpu.pipeline_mode<synchronous>, transform_indices = @transform_6, window_bounds = array<i64: 8, 4>}, {pipeline_mode = #tpu.pipeline_mode<synchronous>, transform_indices = @transform_7, window_bounds = array<i64: 2, 8>}, {transform_indices = @transform_8, window_bounds = array<i64: 1>}, {transform_indices = @transform_9, window_bounds = array<i64: 2, 4>}, {transform_indices = @transform_10, window_bounds = array<i64: 2, 4>}, {transform_indices = @transform_11, window_bounds = array<i64: 2, 1>}]} {
    %c0 = arith.constant 0 : index
    %c0_0 = arith.constant 0 : index
    %0 = vector.load %arg2[%c0, %c0_0] : memref<128x128xf32, #tpu.memory_space<vmem>>, vector<128x128xf32>
    %c0_1 = arith.constant 0 : index
    %c0_2 = arith.constant 0 : index
    %1 = vector.load %arg1[%c0_1, %c0_2] : memref<8x128xf32, #tpu.memory_space<vmem>>, vector<8x128xf32>
    %cst = arith.constant dense<0.000000e+00> : vector<8x128xf32>
    %2 = tpu.matmul %1, %0, %cst {dimension_numbers = #tpu.dot_dimension_numbers<[1], [0], [0], [1], [0, 0, 1, 1], [], []>} : vector<8x128xf32>, vector<128x128xf32>, vector<8x128xf32> -> vector<8x128xf32>
    %c0_3 = arith.constant 0 : index
    %c0_4 = arith.constant 0 : index
    %3 = vector.load %arg3[%c0_3, %c0_4] : memref<1x128xf32, #tpu.memory_space<vmem>>, vector<1x128xf32>
    %4 = vector.broadcast %3 : vector<1x128xf32> to vector<8x128xf32>
    %5 = arith.addf %2, %4 : vector<8x128xf32>
    %6 = math.tanh %5 : vector<8x128xf32>
    %cst_5 = arith.constant dense<0.000000e+00> : vector<8xf32>
    %7 = vector.multi_reduction <add>, %6, %cst_5 [1] : vector<8x128xf32> to vector<8xf32>
    %8 = vector.shape_cast %7 : vector<8xf32> to vector<8x1xf32>
    %cst_6 = arith.constant 1.280000e+02 : f32
    %9 = vector.broadcast %cst_6 : f32 to vector<8x1xf32>
    %10 = arith.divf %8, %9 : vector<8x1xf32>
    %11 = arith.mulf %6, %6 : vector<8x128xf32>
    %cst_7 = arith.constant dense<0.000000e+00> : vector<8xf32>
    %12 = vector.multi_reduction <add>, %11, %cst_7 [1] : vector<8x128xf32> to vector<8xf32>
    %13 = vector.shape_cast %12 : vector<8xf32> to vector<8x1xf32>
    %cst_8 = arith.constant 1.280000e+02 : f32
    %14 = vector.broadcast %cst_8 : f32 to vector<8x1xf32>
    %15 = arith.divf %13, %14 : vector<8x1xf32>
    %16 = arith.mulf %10, %10 : vector<8x1xf32>
    %17 = arith.subf %15, %16 : vector<8x1xf32>
    %18 = vector.broadcast %10 : vector<8x1xf32> to vector<8x128xf32>
    %19 = arith.subf %6, %18 : vector<8x128xf32>
    %cst_9 = arith.constant 9.99999974E-6 : f32
    %20 = vector.broadcast %cst_9 : f32 to vector<8x1xf32>
    %21 = arith.addf %17, %20 : vector<8x1xf32>
    %22 = math.rsqrt %21 : vector<8x1xf32>
    %23 = vector.broadcast %22 : vector<8x1xf32> to vector<8x128xf32>
    %24 = arith.mulf %19, %23 : vector<8x128xf32>
    %c0_10 = arith.constant 0 : index
    %c0_11 = arith.constant 0 : index
    %25 = vector.load %arg4[%c0_10, %c0_11] : memref<1x128xf32, #tpu.memory_space<vmem>>, vector<1x128xf32>
    %26 = vector.broadcast %25 : vector<1x128xf32> to vector<8x128xf32>
    %27 = arith.mulf %24, %26 : vector<8x128xf32>
    %c0_12 = arith.constant 0 : index
    %c0_13 = arith.constant 0 : index
    %28 = vector.load %arg5[%c0_12, %c0_13] : memref<1x128xf32, #tpu.memory_space<vmem>>, vector<1x128xf32>
    %29 = vector.broadcast %28 : vector<1x128xf32> to vector<8x128xf32>
    %30 = arith.addf %27, %29 : vector<8x128xf32>
    %c0_14 = arith.constant 0 : index
    %c0_15 = arith.constant 0 : index
    %31 = vector.load %arg6[%c0_14, %c0_15] : memref<1x128xf32, #tpu.memory_space<vmem>>, vector<1x128xf32>
    %32 = vector.broadcast %31 : vector<1x128xf32> to vector<8x128xf32>
    %33 = arith.mulf %30, %32 : vector<8x128xf32>
    %cst_16 = arith.constant dense<0.000000e+00> : vector<8xf32>
    %34 = vector.multi_reduction <add>, %33, %cst_16 [1] : vector<8x128xf32> to vector<8xf32>
    %35 = vector.shape_cast %34 : vector<8xf32> to vector<8x1xf32>
    %c0_17 = arith.constant 0 : index
    %36 = memref.load %arg9[%c0_17] : memref<1xf32, #tpu.memory_space<smem>>
    %37 = vector.broadcast %36 : f32 to vector<8x1xf32>
    %38 = arith.addf %35, %37 : vector<8x1xf32>
    %c0_18 = arith.constant 0 : index
    %c0_19 = arith.constant 0 : index
    %39 = vector.load %arg8[%c0_18, %c0_19] : memref<2x8xf32, #tpu.memory_space<vmem>>, vector<2x8xf32>
    %c0_20 = arith.constant 0 : index
    %c0_21 = arith.constant 0 : index
    %40 = vector.load %arg7[%c0_20, %c0_21] : memref<8x4xf32, #tpu.memory_space<vmem>>, vector<8x4xf32>
    %41 = vector.broadcast %38 : vector<8x1xf32> to vector<8x4xf32>
    %42 = arith.mulf %41, %40 : vector<8x4xf32>
    %cst_22 = arith.constant dense<0.000000e+00> : vector<2x4xf32>
    %43 = tpu.matmul %39, %42, %cst_22 {dimension_numbers = #tpu.dot_dimension_numbers<[1], [0], [0], [1], [0, 0, 1, 1], [], []>} : vector<2x8xf32>, vector<8x4xf32>, vector<2x4xf32> -> vector<2x4xf32>
    %c0_23 = arith.constant 0 : index
    %c0_24 = arith.constant 0 : index
    %44 = vector.load %arg10[%c0_23, %c0_24] : memref<2x4xf32, #tpu.memory_space<vmem>>, vector<2x4xf32>
    tpu.vector_store %arg10[%c0_23, %c0_24], %43 {strides = array<i32>} : memref<2x4xf32, #tpu.memory_space<vmem>>, vector<2x4xf32>,
    %cst_25 = arith.constant dense<0xFF800000> : vector<2xf32>
    %45 = vector.multi_reduction <maximumf>, %43, %cst_25 [1] : vector<2x4xf32> to vector<2xf32>
    %46 = vector.shape_cast %45 : vector<2xf32> to vector<2x1xf32>
    %47 = vector.broadcast %46 : vector<2x1xf32> to vector<2x4xf32>
    %48 = arith.subf %43, %47 : vector<2x4xf32>
    %49 = math.exp %48 : vector<2x4xf32>
    %cst_26 = arith.constant dense<0.000000e+00> : vector<2xf32>
    %50 = vector.multi_reduction <add>, %49, %cst_26 [1] : vector<2x4xf32> to vector<2xf32>
    %51 = vector.shape_cast %50 : vector<2xf32> to vector<2x1xf32>
    %52 = vector.broadcast %51 : vector<2x1xf32> to vector<2x4xf32>
    %53 = arith.divf %49, %52 : vector<2x4xf32>
    %c0_27 = arith.constant 0 : index
    %c0_28 = arith.constant 0 : index
    %54 = vector.load %arg11[%c0_27, %c0_28] : memref<2x4xf32, #tpu.memory_space<vmem>>, vector<2x4xf32>
    tpu.vector_store %arg11[%c0_27, %c0_28], %53 {strides = array<i32>} : memref<2x4xf32, #tpu.memory_space<vmem>>, vector<2x4xf32>,
    %55 = tpu.iota {dimensions = array<i32: 1>} : vector<2x4xi32>
    %56 = vector.broadcast %46 : vector<2x1xf32> to vector<2x4xf32>
    %57 = arith.cmpf oeq, %43, %56 : vector<2x4xf32>
    %c4_i32 = arith.constant 4 : i32
    %58 = vector.broadcast %c4_i32 : i32 to vector<2x4xi32>
    %59 = arith.select %57, %55, %58 : vector<2x4xi1>, vector<2x4xi32>
    %cst_29 = arith.constant dense<2147483647> : vector<2xi32>
    %60 = vector.multi_reduction <minsi>, %59, %cst_29 [1] : vector<2x4xi32> to vector<2xi32>
    %61 = vector.shape_cast %60 : vector<2xi32> to vector<2x1xi32>
    %c3_i32 = arith.constant 3 : i32
    %62 = vector.broadcast %c3_i32 : i32 to vector<2x1xi32>
    %63 = arith.minsi %61, %62 : vector<2x1xi32>
    %c0_30 = arith.constant 0 : index
    %c0_31 = arith.constant 0 : index
    %64 = vector.load %arg12[%c0_30, %c0_31] : memref<2x1xi32, #tpu.memory_space<vmem>>, vector<2x1xi32>
    tpu.vector_store %arg12[%c0_30, %c0_31], %63 {strides = array<i32>} : memref<2x1xi32, #tpu.memory_space<vmem>>, vector<2x1xi32>,
    return
  }
  func.func @transform_0(%arg0: i32) -> (i32, i32) {
    %c0_i32 = arith.constant 0 : i32
    %c0_i32_0 = arith.constant 0 : i32
    return %arg0, %c0_i32 : i32, i32
  }
  func.func @transform_1(%arg0: i32) -> (i32, i32) {
    %c0_i32 = arith.constant 0 : i32
    %c0_i32_0 = arith.constant 0 : i32
    %c0_i32_1 = arith.constant 0 : i32
    return %c0_i32, %c0_i32_0 : i32, i32
  }
  func.func @transform_2(%arg0: i32) -> (i32, i32) {
    %c0_i32 = arith.constant 0 : i32
    %c0_i32_0 = arith.constant 0 : i32
    %c0_i32_1 = arith.constant 0 : i32
    return %c0_i32, %c0_i32_0 : i32, i32
  }
  func.func @transform_3(%arg0: i32) -> (i32, i32) {
    %c0_i32 = arith.constant 0 : i32
    %c0_i32_0 = arith.constant 0 : i32
    %c0_i32_1 = arith.constant 0 : i32
    return %c0_i32, %c0_i32_0 : i32, i32
  }
  func.func @transform_4(%arg0: i32) -> (i32, i32) {
    %c0_i32 = arith.constant 0 : i32
    %c0_i32_0 = arith.constant 0 : i32
    %c0_i32_1 = arith.constant 0 : i32
    return %c0_i32, %c0_i32_0 : i32, i32
  }
  func.func @transform_5(%arg0: i32) -> (i32, i32) {
    %c0_i32 = arith.constant 0 : i32
    %c0_i32_0 = arith.constant 0 : i32
    %c0_i32_1 = arith.constant 0 : i32
    return %c0_i32, %c0_i32_0 : i32, i32
  }
  func.func @transform_6(%arg0: i32) -> (i32, i32) {
    %c0_i32 = arith.constant 0 : i32
    %c0_i32_0 = arith.constant 0 : i32
    %c0_i32_1 = arith.constant 0 : i32
    return %c0_i32, %c0_i32_0 : i32, i32
  }
  func.func @transform_7(%arg0: i32) -> (i32, i32) {
    %c0_i32 = arith.constant 0 : i32
    %c0_i32_0 = arith.constant 0 : i32
    %c0_i32_1 = arith.constant 0 : i32
    return %c0_i32, %c0_i32_0 : i32, i32
  }
  func.func @transform_8(%arg0: i32) -> i32 {
    %c0_i32 = arith.constant 0 : i32
    %c0_i32_0 = arith.constant 0 : i32
    return %c0_i32 : i32
  }
  func.func @transform_9(%arg0: i32) -> (i32, i32) {
    %c0_i32 = arith.constant 0 : i32
    %c0_i32_0 = arith.constant 0 : i32
    return %arg0, %c0_i32 : i32, i32
  }
  func.func @transform_10(%arg0: i32) -> (i32, i32) {
    %c0_i32 = arith.constant 0 : i32
    %c0_i32_0 = arith.constant 0 : i32
    return %arg0, %c0_i32 : i32, i32
  }
  func.func @transform_11(%arg0: i32) -> (i32, i32) {
    %c0_i32 = arith.constant 0 : i32
    %c0_i32_0 = arith.constant 0 : i32
    return %arg0, %c0_i32 : i32, i32
  }
}

</mosaic_0001>

<bundles_post_ra>
// kernel: tpu_custom_call.1
= control target key start
LH: loop header
LB: loop body
LE: loop exit
PB: predicated region body
PF: predicated region fallthrough
CT: control target
= control target key end

     0   :  { %18 = vsyncpa [#allocation4], 0  ;;  %s707_s0 = inlined_call_operand.hbm [shape: f32[8,1024], index: 0, kind: input, shape index: {}]   ;;  %s708_s1 = inlined_call_operand.hbm [shape: f32[128,128], index: 1, kind: input, shape index: {}]   ;;  %s709_s2 = inlined_call_operand.vmem [shape: f32[1,128], index: 2, kind: input, shape index: {}]   ;;  %s710_s3 = inlined_call_operand.vmem [shape: f32[1,128], index: 3, kind: input, shape index: {}]   ;;  %s711_s4 = inlined_call_operand.vmem [shape: f32[1,128], index: 4, kind: input, shape index: {}]   ;;  %s712_s5 = inlined_call_operand.vmem [shape: f32[1,128], index: 5, kind: input, shape index: {}]   ;;  %s713_s6 = inlined_call_operand.vmem [shape: f32[8,4], index: 6, kind: input, shape index: {}]   ;;  %s714_s7 = inlined_call_operand.vmem [shape: f32[2,8], index: 7, kind: input, shape index: {}]   ;;  %s715_s8 = inlined_call_operand.<no memory space> [shape: f32[1], index: 8, kind: input, shape index: {}]   ;;  %s716_s9 = inlined_call_operand.hbm [shape: f32[2,4], index: 9, kind: output, shape index: {0}]   ;;  %s717_s10 = inlined_call_operand.hbm [shape: f32[2,4], index: 10, kind: output, shape index: {1}]   ;;  %s718_s11 = inlined_call_operand.vmem [shape: s32[2,1], index: 11, kind: output, shape index: {2}]  }
   0x1   :  { %19 = vsyncpa [#allocation7], 0 }
   0x2   :  { %20 = vsyncpa [#allocation5], 0 }
   0x3   :  { %21 = vsyncpa [#allocation10], 0  ;;  %s551_s17 = smov [#allocation3]   ;;  %s552_s19 = smov [#allocation6]  }
   0x4   :  { %s28_s18 = sshll.u32 %s551_s17, 4  ;;  %s37_s20 = sshll.u32 %s552_s19, 4  ;;  %s29_s18 = int_to_ptr.vmem [resolvable:$true] %s28_s18  ;;  %s620_s20 = int_to_ptr.vmem [resolvable:$true] %s37_s20 }
   0x5   :  { %s455_s23 = scalar_lea.hbm %s707_s0, 128  ;;  %s457_s28 = scalar_lea.hbm %s707_s0, 1024 }
   0x6   :  { %p456_p0 = scmp.ne.s32.totalorder %s707_s0, %s455_s23  ;;  %p458_p1 = scmp.lt.u32.totalorder %s457_s28, %s455_s23 }
   0x7   :  { %p459_p2 = scmp.lt.u32.totalorder %s455_s23, %s707_s0 }
   0x9   :  { %p460_p3 = por %p459_p2, %p458_p1 }
   0xb   :  { %p461_p4 = pnand %p460_p3, %p456_p0 }
   0xd   :  { %464 = shalt.err (!%p461_p4)
}
   0xe   :  { %s465_s12 = scalar_lea.vmem %s29_s18, 128  ;;  %p470_p6 = scmp.lt.s32.totalorder %s29_s18, %s29_s18 }
   0xf   :  { %p466_p5 = scmp.ne.s32.totalorder %s29_s18, %s465_s12  ;;  %p471_p7 = scmp.lt.s32.totalorder %s465_s12, %s465_s12 }
  0x11   :  { %p472_p8 = por %p471_p7, %p470_p6 }
  0x13   :  { %p473_p9 = pnand %p472_p8, %p466_p5 }
  0x15   :  { %476 = shalt.err (!%p473_p9)
}
  0x16   :  { %31 = dma.hbm_to_vmem [thread:$0]  %s707_s0, 128, %s29_s18, [#allocation4]  }
  0x17   :  { %s477_s17 = scalar_lea.hbm %s708_s1, 2048 }
  0x18   :  { %p478_p10 = scmp.ne.s32.totalorder %s708_s1, %s477_s17  ;;  %p481_p11 = scmp.lt.u32.totalorder %s477_s17, %s708_s1 }
  0x1a   :  { %p483_p12 = pnand %p481_p11, %p478_p10 }
  0x1c   :  { %486 = shalt.err (!%p483_p12)
}
  0x1d   :  { %s487_s24 = scalar_lea.vmem %s620_s20, 2048  ;;  %p492_p0 = scmp.lt.s32.totalorder %s620_s20, %s620_s20 }
  0x1e   :  { %p488_p13 = scmp.ne.s32.totalorder %s620_s20, %s487_s24  ;;  %p493_p1 = scmp.lt.s32.totalorder %s487_s24, %s487_s24 }
  0x20   :  { %p494_p2 = por %p493_p1, %p492_p0 }
  0x22   :  { %p495_p3 = pnand %p494_p2, %p488_p13 }
  0x24   :  { %498 = shalt.err (!%p495_p3)
}
  0x25   :  { %s553_s0 = smov 128   ;;  %s554_s18 = smov 8  }
  0x26   :  { %43 = dma.hbm_to_vmem [thread:$0]  %s708_s1, 2048, %s620_s20, [#allocation7], %s553_s0, %s553_s0, %s554_s18  }
  0x27   :  { %543 = dma.done.wait [#allocation4], 128  }
  0x28   :  { %544 = vsyncadd [#allocation4], 4294967168 }
  0x29   :  { %545 = dma.done.wait [#allocation7], 2048  }
  0x2a   :  { %546 = vsyncadd [#allocation7], 4294965248  ;;  %v555_v0 = vmov 0.0|0.0   ;;  %vm556_vm0 = vmmov 0   ;;  %v557_v1 = vmov 0.0   ;;  %v64_v2 = vld [vmem:[#allocation6] sm:$0xff]  ;;  %v200_v49 = vstv %s715_s8 }
  0x2b   :  { %414 = vmatprep.subr.bf16.mxu0 %v555_v0  ;;  %406 = vmatprep.mubr.msk.f32.mxu0 %vm556_vm0, %v557_v1  ;;  %v65_v3 = vld [vmem:[#allocation6 + $0x8] sm:$0xff]  ;;  %v66_v4 = vld [vmem:[#allocation6 + $0x10] sm:$0xff]  ;;  %v67_v6 = vld [vmem:[#allocation6 + $0x18] sm:$0xff]  ;;  %vm205_vm1 = vcmask 64512   ;;  %vm279_vm2 = vcmask 25600   ;;  %v293_v58 = vlaneseq }
  0x2c   :  { %409 = vmatprep.subr.mxu1 %v557_v1  ;;  %411 = vmatprep.mubr.msk.f32.mxu1 %vm556_vm0, %v557_v1  ;;  %v415_v5 = vpack.c.bf16 %v65_v3, %v64_v2  ;;  %v418_v7 = vpack.c.bf16 %v67_v6, %v66_v4  ;;  %v68_v8 = vld [vmem:[#allocation6 + $0x20] sm:$0xff]  ;;  %v69_v9 = vld [vmem:[#allocation6 + $0x28] sm:$0xff]  ;;  %v70_v11 = vld [vmem:[#allocation6 + $0x30] sm:$0xff] }
  0x2d   :  { %v421_v10 = vpack.c.bf16 %v69_v9, %v68_v8  ;;  %v71_v12 = vld [vmem:[#allocation6 + $0x38] sm:$0xff]  ;;  %v72_v14 = vld [vmem:[#allocation6 + $0x40] sm:$0xff]  ;;  %v73_v15 = vld [vmem:[#allocation6 + $0x48] sm:$0xff]  ;;  %v294_v59 = vand.u32 127, %v293_v58 }
  0x2e   :  { %416 = vmatpush3.bf16.msra.mxu0 %v415_v5  ;;  %v424_v13 = vpack.c.bf16 %v71_v12, %v70_v11  ;;  %v427_v16 = vpack.c.bf16 %v73_v15, %v72_v14  ;;  %v74_v17 = vld [vmem:[#allocation6 + $0x50] sm:$0xff]  ;;  %v75_v18 = vld [vmem:[#allocation6 + $0x58] sm:$0xff]  ;;  %v76_v20 = vld [vmem:[#allocation6 + $0x60] sm:$0xff] }
  0x2f   :  { %417 = vmatprep.subr.bf16.mxu0 %v555_v0  ;;  %v430_v19 = vpack.c.bf16 %v75_v18, %v74_v17  ;;  %v77_v21 = vld [vmem:[#allocation6 + $0x68] sm:$0xff]  ;;  %v78_v23 = vld [vmem:[#allocation6 + $0x70] sm:$0xff]  ;;  %v79_v24 = vld [vmem:[#allocation6 + $0x78] sm:$0xff] }
  0x30   :  { %v433_v22 = vpack.c.bf16 %v77_v21, %v76_v20  ;;  %v436_v25 = vpack.c.bf16 %v79_v24, %v78_v23  ;;  %v80_v26 = vld [vmem:[#allocation3] sm:$0xff] }
  0x31   :  { %v350_v27 = vld [vmem:[%s709_s2] ss:$0 sm:$0xff] }
  0x32   :  { %419 = vmatpush3.bf16.msra.mxu0 %v418_v7  ;;  %v351_v42 = vld [vmem:[%s710_s3] ss:$0 sm:$0xff] }
  0x33   :  { %420 = vmatprep.subr.bf16.mxu0 %v555_v0  ;;  %v352_v44 = vld [vmem:[%s711_s4] ss:$0 sm:$0xff] }
  0x34   :  { %v353_v46 = vld [vmem:[%s712_s5] ss:$0 sm:$0xff]  ;;  %s558_s5 = smov [#allocation8]  }
  0x35   :  { %v203_v51 = vld [vmem:[%s713_s6] sm:$0xff]  ;;  %s322_s6 = sshll.u32 %s558_s5, 4  ;;  %s323_s6 = int_to_ptr.vmem [resolvable:$true] %s322_s6 }
  0x36   :  { %422 = vmatpush3.bf16.msra.mxu0 %v421_v10  ;;  %v202_v54 = vld [vmem:[%s714_s7] sm:$0x3]  ;;  %s559_s7 = smov [#allocation9]   ;;  %s499_s17 = scalar_lea.vmem %s323_s6, 32 }
  0x37   :  { %423 = vmatprep.subr.bf16.mxu0 %v555_v0  ;;  %s332_s8 = sshll.u32 %s559_s7, 4  ;;  %p500_p4 = scmp.ne.s32.totalorder %s323_s6, %s499_s17  ;;  %s333_s8 = int_to_ptr.vmem [resolvable:$true] %s332_s8 }
  0x38   :  { %p504_p5 = scmp.lt.s32.totalorder %s323_s6, %s323_s6  ;;  %p505_p6 = scmp.lt.s32.totalorder %s499_s17, %s499_s17 }
  0x3a   :  { %425 = vmatpush3.bf16.msra.mxu0 %v424_v13  ;;  %p506_p7 = por %p505_p6, %p504_p5 }
  0x3b   :  { %426 = vmatprep.subr.bf16.mxu0 %v555_v0 }
  0x3c   :  { %p507_p8 = pnand %p506_p7, %p500_p4 }
  0x3e   :  { %428 = vmatpush3.bf16.msra.mxu0 %v427_v16 }
  0x3f   :  { %429 = vmatprep.subr.bf16.mxu0 %v555_v0 }
  0x42   :  { %431 = vmatpush3.bf16.msra.mxu0 %v430_v19 }
  0x43   :  { %432 = vmatprep.subr.bf16.mxu0 %v555_v0 }
  0x46   :  { %434 = vmatpush3.bf16.msra.mxu0 %v433_v22 }
  0x47   :  { %435 = vmatprep.subr.bf16.mxu0 %v555_v0 }
  0x4a   :  { %437 = vmatpush3.bf16.msra.mxu0 %v436_v25 }
  0x4d   :  { %407 = vmatmul.mubr.f32.vlgmr.msra.gmra.mrb[0].mxu0 %v80_v26 }
 0x120   :  { %v154_v28 = vpop.f32.mrb[0].mxu0 }
 0x121   :  { %v155_v29 = vadd.f32 %v350_v27, %v154_v28  ;;  %v408_v30 = vpop.f32.mrb[1].mxu0 }
 0x123   :  { %447 = vtanh.f32 %v155_v29 }
 0x12d   :  { %v448_v31 = vpop.eup %447 }
 0x12e   :  { %159 = vadd.xlane.f32.xlu0 %v448_v31  ;;  %v163_v32 = vmul.f32 %v448_v31, %v448_v31 }
 0x132   :  { %164 = vadd.xlane.f32.xlu0 %v163_v32 }
 0x1bb   :  { %v160_v33 = vpop.xlane.xlu0 %159 }
 0x1bc   :  { %v162_v34 = vmul.f32 0.0078125, %v160_v33 }
 0x1be   :  { %v167_v36 = vmul.f32 %v162_v34, %v162_v34  ;;  %v169_v40 = vsub.f32 %v448_v31, %v162_v34 }
 0x1bf   :  { %v165_v35 = vpop.xlane.xlu0 %164 }
 0x1c0   :  { %v166_v37 = vmul.f32 0.0078125, %v165_v35 }
 0x1c2   :  { %v168_v38 = vsub.f32 %v166_v37, %v167_v36 }
 0x1c4   :  { %v170_v39 = vadd.f32 1e-05, %v168_v38 }
 0x1c6   :  { %449 = vrsqrt.f32 %v170_v39 }
 0x1d0   :  { %v450_v41 = vpop.eup %449 }
 0x1d1   :  { %v172_v43 = vmul.f32 %v450_v41, %v169_v40 }
 0x1d3   :  { %v180_v45 = vmul.f32 %v351_v42, %v172_v43 }
 0x1d5   :  { %v188_v47 = vadd.f32 %v352_v44, %v180_v45 }
 0x1d7   :  { %v196_v48 = vmul.f32 %v353_v46, %v188_v47 }
 0x1d9   :  { %197 = vadd.xlane.f32.xlu1 %v196_v48 }
 0x266   :  { %v198_v50 = vpop.xlane.xlu1 %197 }
 0x267   :  { %v201_v52 = vadd.f32 %v200_v49, %v198_v50 }
 0x269   :  { %v204_v53 = vmul.f32 %v203_v51, %v201_v52 }
 0x26b   :  { %410 = vmatpush3.msra.mxu1 %v204_v53 }
 0x26c   :  { %412 = vmatmul.mubr.msk.f32.vlgmr.msra.gmra.mrb[0].mxu1 %vm205_vm1, %v202_v54 }
 0x33f   :  { %v275_v55 = vpop.f32.mrb[0].mxu1 }
 0x340   :  { %v413_v56 = vpop.f32.mrb[1].mxu1  ;;  %v281_v57 = vsel %vm279_vm2, %v275_v55, -inf  ;;  %280 = vst.msk [vmem:[#allocation8] sm:$0x3] %vm279_vm2, %v275_v55 }
 0x341   :  { %282 = vmax.xlane.f32.xlu1 %v281_v57 }
 0x3ce   :  { %v283_v60 = vpop.xlane.xlu1 %282 }
 0x3cf   :  { %v284_v61 = vsub.f32 %v275_v55, %v283_v60  ;;  %vm295_vm3 = vcmp.eq.f32.partialorder %v275_v55, %v283_v60 }
 0x3d0   :  { %v296_v62 = vsel %vm295_vm3, %v294_v59, 4 }
 0x3d1   :  { %v285_v63 = vmul.f32 1.442695, %v284_v61  ;;  %v297_v0 = vsel %vm279_vm2, %v296_v62, 2147483647 }
 0x3d2   :  { %v299_v1 = vshra.s32 %v297_v0, 16  ;;  %v298_v5 = vand.u32 65535, %v297_v0 }
 0x3d3   :  { %451 = vpow2.f32 %v285_v63 }
 0x3d4   :  { %v301_v2 = vcvt.s32.f32 %v299_v1  ;;  %v300_v7 = vcvt.s32.f32 %v298_v5 }
 0x3d6   :  { %302 = vmin.xlane.f32.xlu0 %v301_v2 }
 0x3dd   :  { %v452_v3 = vpop.eup %451 }
 0x3de   :  { %v287_v4 = vsel %vm279_vm2, %v452_v3, 0.0 }
 0x3df   :  { %288 = vadd.xlane.f32.xlu1 %v287_v4 }
 0x463   :  { %v303_v6 = vpop.xlane.xlu0 %302 }
 0x464   :  { %vm304_vm4 = vcmp.eq.f32.partialorder %v301_v2, %v303_v6 }
 0x465   :  { %v305_v8 = vsel %vm304_vm4, %v300_v7, inf }
 0x466   :  { %306 = vmin.xlane.f32.xlu0 %v305_v8 }
 0x46c   :  { %v289_v9 = vpop.xlane.xlu1 %288 }
 0x46d   :  { %453 = vrcp.f32 %v289_v9 }
 0x477   :  { %v454_v10 = vpop.eup %453 }
 0x478   :  { %v291_v11 = vmul.f32 %v454_v10, %v452_v3 }
 0x479   :  { %510 = shalt.err (!%p507_p8)
}
 0x47a   :  { %s511_s22 = scalar_lea.hbm %s716_s9, 32 }
 0x47b   :  { %p512_p9 = scmp.ne.s32.totalorder %s716_s9, %s511_s22  ;;  %p515_p10 = scmp.lt.u32.totalorder %s511_s22, %s716_s9 }
 0x47d   :  { %p517_p11 = pnand %p515_p10, %p512_p9 }
 0x47f   :  { %520 = shalt.err (!%p517_p11)
}
 0x480   :  { %325 = dma.vmem_to_hbm [thread:$0]  %s323_s6, 32, %s716_s9, [#allocation5]   ;;  %292 = vst.msk [vmem:[#allocation9] sm:$0x3] %vm279_vm2, %v291_v11 }
 0x481   :  { %s521_s1 = scalar_lea.vmem %s333_s8, 32  ;;  %p526_p13 = scmp.lt.s32.totalorder %s333_s8, %s333_s8 }
 0x482   :  { %p522_p12 = scmp.ne.s32.totalorder %s333_s8, %s521_s1  ;;  %p527_p0 = scmp.lt.s32.totalorder %s521_s1, %s521_s1 }
 0x484   :  { %p528_p1 = por %p527_p0, %p526_p13 }
 0x486   :  { %p529_p2 = pnand %p528_p1, %p522_p12 }
 0x488   :  { %532 = shalt.err (!%p529_p2)
}
 0x489   :  { %s533_s2 = scalar_lea.hbm %s717_s10, 32 }
 0x48a   :  { %p534_p3 = scmp.ne.s32.totalorder %s717_s10, %s533_s2  ;;  %p537_p4 = scmp.lt.u32.totalorder %s533_s2, %s717_s10 }
 0x48c   :  { %p539_p5 = pnand %p537_p4, %p534_p3 }
 0x48e   :  { %542 = shalt.err (!%p539_p5)
}
 0x48f   :  { %335 = dma.vmem_to_hbm [thread:$0]  %s333_s8, 32, %s717_s10, [#allocation10]   ;;  %v309_v12 = vcvt.f32.s32 %v303_v6  ;;  %vm314_vm5 = vcmask 1024  }
 0x491   :  { %v310_v14 = vshll.u32 %v309_v12, 16 }
 0x4f3   :  { %v307_v13 = vpop.xlane.xlu0 %306 }
 0x4f4   :  { %v308_v15 = vcvt.f32.s32 %v307_v13 }
 0x4f6   :  { %v311_v16 = vadd.s32 %v310_v14, %v308_v15 }
 0x4f8   :  { %vm312_vm6 = vcmp.lt.s32.totalorder %v311_v16, 3 }
 0x4f9   :  { %v313_v17 = vsel %vm312_vm6, %v311_v16, 3 }
 0x4fa   :  { %315 = vst.msk [vmem:[%s718_s11] sm:$0x3] %vm314_vm5, %v313_v17 }
 0x4fb   :  { %547 = dma.done.wait [#allocation5], 32  }
 0x4fc   :  { %548 = vsyncadd [#allocation5], 4294967264 }
 0x4fd   :  { %549 = dma.done.wait [#allocation10], 32  }
 0x4fe   :  { %550 = vsyncadd [#allocation10], 4294967264 }
 0x4ff   :  { %346 = vsyncpa [#allocation4], 1 }
 0x500   :  { %347 = vsyncpa [#allocation7], 1 }
 0x501   :  { %348 = vsyncpa [#allocation5], 1 }
 0x502   :  { %349 = vsyncpa [#allocation10], 1 }

</bundles_post_ra>
